<compile_context>
chip_gen: v7x
topology: tpu7x:2x2x1
jax: 0.10.0
libtpu: 0.0.40
codegen_flags: <defaults>
</compile_context>

<pallas_src>
import jax
import jax.numpy as jnp
from jax.experimental import pallas as pl
from jax.experimental.pallas import tpu as pltpu

IN_DIM = 4
HID_DIM = 8
OUT_DIM = 3

_LANE = 128            # batch padding granularity (batch sits on the lane axis)
_MAX_TILE_B = 32768    # max rows per grid step (~256 KiB x + ~1 MiB f32 scratch)
_MEGACORE_MIN_B = 2048 # above this, force >=2 grid steps (v7x megacore)


def _round_up(n, m):
    return ((n + m - 1) // m) * m


def _cdiv(a, b):
    return -(-a // b)


def _mlp_kernel(x_ref, w1_ref, b1_ref, w2_ref, b2_ref, w3_ref, b3_ref, o_ref):
    """Fused 3-layer MLP forward for one batch tile, batch on the lane axis.

    x tile: (4, TILE_B) bf16.  Weights W^T / biases (:,1): f32, resident in VMEM.
    All matmuls accumulate in f32; activations stay f32 throughout."""
    x = x_ref[...]                                                       # (4, TILE_B)
    h1 = jnp.dot(w1_ref[...], x, preferred_element_type=jnp.float32)    # (8, TILE_B)
    h1 = jnp.maximum(h1 + b1_ref[...], 0.0)
    h2 = jnp.dot(w2_ref[...], h1, preferred_element_type=jnp.float32)   # (8, TILE_B)
    h2 = jnp.maximum(h2 + b2_ref[...], 0.0)
    out = jnp.dot(w3_ref[...], h2, preferred_element_type=jnp.float32)  # (3, TILE_B)
    o_ref[...] = out + b3_ref[...]


@jax.jit
def iris_forward(x, params):
    """x: (B, 4) float32 -> logits: (B, 3) float32."""
    w1, b1, w2, b2, w3, b3 = params   # w: (in, out), b: (out,)
    B = x.shape[0]

    # --- batch tiling: pad only to the lane requirement, big tiles, >=2 steps
    #     on large batches so v7x megacore can split the grid ---------------
    pad_b = _round_up(max(B, 1), _LANE)
    n_steps = max(1, _cdiv(pad_b, _MAX_TILE_B))
    if pad_b > _MEGACORE_MIN_B:
        n_steps = max(n_steps, 2)
    tile_b = _round_up(_cdiv(pad_b, n_steps), _LANE)
    pad_total = tile_b * n_steps          # waste bounded by < n_steps * 128 rows

    # x^T: (4, pad_total) bf16 — batch on lanes; zero-padded columns only ever
    # see bias/ReLU and are sliced off after the kernel.
    xT = x.astype(jnp.bfloat16).T
    if pad_total != B:
        xT = jnp.pad(xT, ((0, 0), (0, pad_total - B)))

    # Transposed weights / column biases, all f32 and resident in VMEM.
    w1t = w1.T.astype(jnp.float32)           # (8, 4)
    w2t = w2.T.astype(jnp.float32)           # (8, 8)
    w3t = w3.T.astype(jnp.float32)           # (3, 8)
    b1c = b1.astype(jnp.float32)[:, None]    # (8, 1)
    b2c = b2.astype(jnp.float32)[:, None]    # (8, 1)
    b3c = b3.astype(jnp.float32)[:, None]    # (3, 1)

    resident = lambda i: (0, 0)   # weights/biases: same full block every step

    n_w = IN_DIM * HID_DIM + HID_DIM * HID_DIM + HID_DIM * OUT_DIM
    cost = pl.CostEstimate(
        flops=2 * B * n_w,
        transcendentals=0,
        bytes_accessed=pad_total * (IN_DIM * 2 + OUT_DIM * 4)      # x bf16 + out f32
        + 4 * (n_w + 2 * HID_DIM + OUT_DIM),                       # weights + biases
    )

    outT = pl.pallas_call(
        _mlp_kernel,
        out_shape=jax.ShapeDtypeStruct((OUT_DIM, pad_total), jnp.float32),
        grid_spec=pltpu.PrefetchScalarGridSpec(
            num_scalar_prefetch=0,
            grid=(n_steps,),
            in_specs=[
                pl.BlockSpec((IN_DIM, tile_b), lambda i: (0, i)),   # x^T tile (4, TILE_B)
                pl.BlockSpec((HID_DIM, IN_DIM), resident),          # W1^T (8, 4)
                pl.BlockSpec((HID_DIM, 1), resident),               # b1   (8, 1)
                pl.BlockSpec((HID_DIM, HID_DIM), resident),         # W2^T (8, 8)
                pl.BlockSpec((HID_DIM, 1), resident),               # b2   (8, 1)
                pl.BlockSpec((OUT_DIM, HID_DIM), resident),         # W3^T (3, 8)
                pl.BlockSpec((OUT_DIM, 1), resident),               # b3   (3, 1)
            ],
            out_specs=pl.BlockSpec((OUT_DIM, tile_b), lambda i: (0, i)),
        ),
        compiler_params=pltpu.CompilerParams(
            dimension_semantics=("parallel",),   # batch tiles shard across TCs on v7x
        ),
        cost_estimate=cost,
    )(xT, w1t, b1c, w2t, b2c, w3t, b3c)

    return outT[:, :B].T


def init_params(key):
    """Deterministic init matching torch.nn.Linear shapes, stored as (in, out)."""
    ks = jax.random.split(key, 6)

    def linear_init(kw, kb, fan_in, fan_out):
        bound = 1.0 / jnp.sqrt(jnp.float32(fan_in))
        w = jax.random.uniform(kw, (fan_in, fan_out), jnp.float32, -bound, bound)
        b = jax.random.uniform(kb, (fan_out,), jnp.float32, -bound, bound)
        return w, b

    w1, b1 = linear_init(ks[0], ks[1], IN_DIM, HID_DIM)
    w2, b2 = linear_init(ks[2], ks[3], HID_DIM, HID_DIM)
    w3, b3 = linear_init(ks[4], ks[5], HID_DIM, OUT_DIM)
    return (w1, b1, w2, b2, w3, b3)


def _reference_forward(x, params):
    w1, b1, w2, b2, w3, b3 = params
    h = jnp.maximum(x @ w1 + b1, 0.0)
    h = jnp.maximum(h @ w2 + b2, 0.0)
    return h @ w3 + b3


if __name__ == "__main__":
    key = jax.random.PRNGKey(0)
    k_params, k_x = jax.random.split(key)
    params = init_params(k_params)

    # Primary small test (batch=2) -- single 128-row grid step.
    batch = 2
    x = jax.random.normal(k_x, (batch, IN_DIM), jnp.float32)
    out = jax.block_until_ready(iris_forward(x, params))
    ref = _reference_forward(x, params)
    assert out.shape == (batch, OUT_DIM)
    # Only x is bf16 (weights/activations f32), so tolerance can be tight-ish.
    assert jnp.allclose(out, ref, atol=2e-2, rtol=2e-2)

    # Non-multiple-of-128 batch: exercises the lane-padding path.
    x2 = jax.random.normal(jax.random.PRNGKey(1), (37, IN_DIM), jnp.float32)
    out2 = jax.block_until_ready(iris_forward(x2, params))
    ref2 = _reference_forward(x2, params)
    assert out2.shape == (37, OUT_DIM)
    assert jnp.allclose(out2, ref2, atol=2e-2, rtol=2e-2)

    # Larger batch: exercises the multi-step (>=2 parallel grid steps) path.
    x3 = jax.random.normal(jax.random.PRNGKey(2), (2500, IN_DIM), jnp.float32)
    out3 = jax.block_until_ready(iris_forward(x3, params))
    ref3 = _reference_forward(x3, params)
    assert out3.shape == (2500, OUT_DIM)
    assert jnp.allclose(out3, ref3, atol=2e-2, rtol=2e-2)

    print("KERNEL_OK")
</pallas_src>

<mosaic_0001>
module attributes {stable_mosaic.version = 11 : i64} {
  func.func @_mlp_kernel(%arg0: i32, %arg1: memref<4x128xbf16, #tpu.memory_space<vmem>>, %arg2: memref<8x4xf32, #tpu.memory_space<vmem>>, %arg3: memref<8x1xf32, #tpu.memory_space<vmem>>, %arg4: memref<8x8xf32, #tpu.memory_space<vmem>>, %arg5: memref<8x1xf32, #tpu.memory_space<vmem>>, %arg6: memref<3x8xf32, #tpu.memory_space<vmem>>, %arg7: memref<3x1xf32, #tpu.memory_space<vmem>>, %arg8: memref<3x128xf32, #tpu.memory_space<vmem>>) attributes {dimension_semantics = [#tpu.dimension_semantics<parallel>], iteration_bounds = array<i64: 1>, scalar_prefetch = 0 : i64, scratch_operands = 0 : i64, tpu.core_type = #tpu.core_type<tc>, window_params = [{transform_indices = @transform_0, window_bounds = array<i64: 4, 128>}, {pipeline_mode = #tpu.pipeline_mode<synchronous>, transform_indices = @transform_1, window_bounds = array<i64: 8, 4>}, {pipeline_mode = #tpu.pipeline_mode<synchronous>, transform_indices = @transform_2, window_bounds = array<i64: 8, 1>}, {pipeline_mode = #tpu.pipeline_mode<synchronous>, transform_indices = @transform_3, window_bounds = array<i64: 8, 8>}, {pipeline_mode = #tpu.pipeline_mode<synchronous>, transform_indices = @transform_4, window_bounds = array<i64: 8, 1>}, {pipeline_mode = #tpu.pipeline_mode<synchronous>, transform_indices = @transform_5, window_bounds = array<i64: 3, 8>}, {pipeline_mode = #tpu.pipeline_mode<synchronous>, transform_indices = @transform_6, window_bounds = array<i64: 3, 1>}, {transform_indices = @transform_7, window_bounds = array<i64: 3, 128>}]} {
    %c0 = arith.constant 0 : index
    %c0_0 = arith.constant 0 : index
    %0 = vector.load %arg1[%c0, %c0_0] : memref<4x128xbf16, #tpu.memory_space<vmem>>, vector<4x128xbf16>
    %c0_1 = arith.constant 0 : index
    %c0_2 = arith.constant 0 : index
    %1 = vector.load %arg2[%c0_1, %c0_2] : memref<8x4xf32, #tpu.memory_space<vmem>>, vector<8x4xf32>
    %cst = arith.constant dense<0.000000e+00> : vector<8x128xf32>
    %2 = tpu.matmul %1, %0, %cst {dimension_numbers = #tpu.dot_dimension_numbers<[1], [0], [0], [1], [0, 0, 1, 1], [], []>} : vector<8x4xf32>, vector<4x128xbf16>, vector<8x128xf32> -> vector<8x128xf32>
    %c0_3 = arith.constant 0 : index
    %c0_4 = arith.constant 0 : index
    %3 = vector.load %arg3[%c0_3, %c0_4] : memref<8x1xf32, #tpu.memory_space<vmem>>, vector<8x1xf32>
    %4 = vector.broadcast %3 : vector<8x1xf32> to vector<8x128xf32>
    %5 = arith.addf %2, %4 : vector<8x128xf32>
    %cst_5 = arith.constant 0.000000e+00 : f32
    %6 = vector.broadcast %cst_5 : f32 to vector<8x128xf32>
    %7 = arith.maximumf %5, %6 : vector<8x128xf32>
    %c0_6 = arith.constant 0 : index
    %c0_7 = arith.constant 0 : index
    %8 = vector.load %arg4[%c0_6, %c0_7] : memref<8x8xf32, #tpu.memory_space<vmem>>, vector<8x8xf32>
    %cst_8 = arith.constant dense<0.000000e+00> : vector<8x128xf32>
    %9 = tpu.matmul %8, %7, %cst_8 {dimension_numbers = #tpu.dot_dimension_numbers<[1], [0], [0], [1], [0, 0, 1, 1], [], []>} : vector<8x8xf32>, vector<8x128xf32>, vector<8x128xf32> -> vector<8x128xf32>
    %c0_9 = arith.constant 0 : index
    %c0_10 = arith.constant 0 : index
    %10 = vector.load %arg5[%c0_9, %c0_10] : memref<8x1xf32, #tpu.memory_space<vmem>>, vector<8x1xf32>
    %11 = vector.broadcast %10 : vector<8x1xf32> to vector<8x128xf32>
    %12 = arith.addf %9, %11 : vector<8x128xf32>
    %cst_11 = arith.constant 0.000000e+00 : f32
    %13 = vector.broadcast %cst_11 : f32 to vector<8x128xf32>
    %14 = arith.maximumf %12, %13 : vector<8x128xf32>
    %c0_12 = arith.constant 0 : index
    %c0_13 = arith.constant 0 : index
    %15 = vector.load %arg6[%c0_12, %c0_13] : memref<3x8xf32, #tpu.memory_space<vmem>>, vector<3x8xf32>
    %cst_14 = arith.constant dense<0.000000e+00> : vector<3x128xf32>
    %16 = tpu.matmul %15, %14, %cst_14 {dimension_numbers = #tpu.dot_dimension_numbers<[1], [0], [0], [1], [0, 0, 1, 1], [], []>} : vector<3x8xf32>, vector<8x128xf32>, vector<3x128xf32> -> vector<3x128xf32>
    %c0_15 = arith.constant 0 : index
    %c0_16 = arith.constant 0 : index
    %17 = vector.load %arg7[%c0_15, %c0_16] : memref<3x1xf32, #tpu.memory_space<vmem>>, vector<3x1xf32>
    %18 = vector.broadcast %17 : vector<3x1xf32> to vector<3x128xf32>
    %19 = arith.addf %16, %18 : vector<3x128xf32>
    %c0_17 = arith.constant 0 : index
    %c0_18 = arith.constant 0 : index
    %20 = vector.load %arg8[%c0_17, %c0_18] : memref<3x128xf32, #tpu.memory_space<vmem>>, vector<3x128xf32>
    tpu.vector_store %arg8[%c0_17, %c0_18], %19 {strides = array<i32>} : memref<3x128xf32, #tpu.memory_space<vmem>>, vector<3x128xf32>,
    return
  }
  func.func @transform_0(%arg0: i32) -> (i32, i32) {
    %c0_i32 = arith.constant 0 : i32
    %c0_i32_0 = arith.constant 0 : i32
    return %c0_i32, %arg0 : i32, i32
  }
  func.func @transform_1(%arg0: i32) -> (i32, i32) {
    %c0_i32 = arith.constant 0 : i32
    %c0_i32_0 = arith.constant 0 : i32
    %c0_i32_1 = arith.constant 0 : i32
    return %c0_i32, %c0_i32_0 : i32, i32
  }
  func.func @transform_2(%arg0: i32) -> (i32, i32) {
    %c0_i32 = arith.constant 0 : i32
    %c0_i32_0 = arith.constant 0 : i32
    %c0_i32_1 = arith.constant 0 : i32
    return %c0_i32, %c0_i32_0 : i32, i32
  }
  func.func @transform_3(%arg0: i32) -> (i32, i32) {
    %c0_i32 = arith.constant 0 : i32
    %c0_i32_0 = arith.constant 0 : i32
    %c0_i32_1 = arith.constant 0 : i32
    return %c0_i32, %c0_i32_0 : i32, i32
  }
  func.func @transform_4(%arg0: i32) -> (i32, i32) {
    %c0_i32 = arith.constant 0 : i32
    %c0_i32_0 = arith.constant 0 : i32
    %c0_i32_1 = arith.constant 0 : i32
    return %c0_i32, %c0_i32_0 : i32, i32
  }
  func.func @transform_5(%arg0: i32) -> (i32, i32) {
    %c0_i32 = arith.constant 0 : i32
    %c0_i32_0 = arith.constant 0 : i32
    %c0_i32_1 = arith.constant 0 : i32
    return %c0_i32, %c0_i32_0 : i32, i32
  }
  func.func @transform_6(%arg0: i32) -> (i32, i32) {
    %c0_i32 = arith.constant 0 : i32
    %c0_i32_0 = arith.constant 0 : i32
    %c0_i32_1 = arith.constant 0 : i32
    return %c0_i32, %c0_i32_0 : i32, i32
  }
  func.func @transform_7(%arg0: i32) -> (i32, i32) {
    %c0_i32 = arith.constant 0 : i32
    %c0_i32_0 = arith.constant 0 : i32
    return %c0_i32, %arg0 : i32, i32
  }
}

</mosaic_0001>

<bundles_post_ra>
// kernel: iris_forward.1
= control target key start
LH: loop header
LB: loop body
LE: loop exit
PB: predicated region body
PF: predicated region fallthrough
CT: control target
= control target key end

     0   :  { %vm39_vm0 = vcmask 1041408   ;;  %v278_v0 = vmov 0.0   ;;  %vm279_vm1 = vmmov 0   ;;  %v280_v4 = vmov 0   ;;  %s350_s0 = inlined_call_operand.vmem [shape: bf16[4,128], index: 0, kind: input, shape index: {}]   ;;  %s351_s1 = inlined_call_operand.vmem [shape: f32[8,4], index: 1, kind: input, shape index: {}]   ;;  %s352_s2 = inlined_call_operand.vmem [shape: f32[8,1], index: 2, kind: input, shape index: {}]   ;;  %s353_s4 = inlined_call_operand.vmem [shape: f32[8,1], index: 4, kind: input, shape index: {}]   ;;  %s354_s3 = inlined_call_operand.vmem [shape: f32[8,8], index: 3, kind: input, shape index: {}]   ;;  %s355_s6 = inlined_call_operand.vmem [shape: f32[3,1], index: 6, kind: input, shape index: {}]   ;;  %s356_s5 = inlined_call_operand.vmem [shape: f32[3,8], index: 5, kind: input, shape index: {}]   ;;  %s357_s7 = inlined_call_operand.vmem [shape: f32[3,128], index: 7, kind: output, shape index: {}]  }
   0x1   :  { %258 = vmatprep.subr.bf16.mxu0 %v278_v0  ;;  %v27_v1 = vld [vmem:[%s350_s0] sm:$0x3]  ;;  %260 = vmatprep.mubr.msk.f32.mxu0 %vm279_vm1, %v278_v0  ;;  %vm35_vm2 = vcmask 31744   ;;  %vm89_vm3 = vcmask 64512  }
   0x2   :  { %v29_v2 = vld [vmem:[%s352_s2] sm:$0xff]  ;;  %v41_v3 = vsel %vm39_vm0, %v27_v1, 0  ;;  %276 = vset.pattern.permute.xlu0 %v280_v4  ;;  %263 = vmatprep.subr.mxu1 %v278_v0 }
   0x3   :  { %259 = vmatpush3.bf16.msra.mxu0 %v41_v3  ;;  %v28_v5 = vld [vmem:[%s351_s1] sm:$0xff]  ;;  %32 = vperm.xlu0 %276, %v29_v2  }
   0x4   :  { %v83_v6 = vld [vmem:[%s353_s4] sm:$0xff]  ;;  %265 = vmatprep.mubr.msk.f32.mxu1 %vm279_vm1, %v278_v0  ;;  %277 = vset.pattern.permute.xlu1 %v280_v4 }
   0x5   :  { %v82_v12 = vld [vmem:[%s354_s3] sm:$0xff] }
   0x6   :  { %261 = vmatmul.mubr.msk.f32.vlgmr.msra.gmra.mrb[0].mxu0 %vm35_vm2, %v28_v5  ;;  %v165_v13 = vld [vmem:[%s355_s6] sm:$0x7] }
   0x7   :  { %86 = vperm.xlu0 %276, %v83_v6   ;;  %168 = vperm.xlu1 %277, %v165_v13   ;;  %v164_v19 = vld [vmem:[%s356_s5] sm:$0x7] }
  0x82   :  { %v33_v7 = vpop.permute.xlu0 %32 }
  0x86   :  { %v87_v14 = vpop.permute.xlu0 %86  ;;  %v169_v20 = vpop.permute.xlu1 %168 }
  0xd9   :  { %v77_v8 = vpop.f32.mrb[0].mxu0 }
  0xda   :  { %v78_v9 = vadd.f32 %v77_v8, %v33_v7  ;;  %v262_v10 = vpop.f32.mrb[1].mxu0 }
  0xdc   :  { %v81_v11 = vmax.f32 %v78_v9, 0.0 }
  0xde   :  { %264 = vmatpush3.msra.mxu1 %v81_v11 }
  0xdf   :  { %266 = vmatmul.mubr.msk.f32.vlgmr.msra.gmra.mrb[0].mxu1 %vm89_vm3, %v82_v12  ;;  %268 = vmatprep.subr.mxu1 %v278_v0 }
  0xe0   :  { %270 = vmatprep.mubr.msk.f32.mxu1 %vm279_vm1, %v278_v0 }
 0x1b2   :  { %v159_v15 = vpop.f32.mrb[0].mxu1 }
 0x1b3   :  { %v160_v16 = vadd.f32 %v159_v15, %v87_v14  ;;  %v267_v17 = vpop.f32.mrb[1].mxu1 }
 0x1b5   :  { %v163_v18 = vmax.f32 %v160_v16, 0.0 }
 0x1b7   :  { %269 = vmatpush3.msra.mxu1 %v163_v18 }
 0x1b8   :  { %271 = vmatmul.mubr.msk.f32.vlgmr.msra.gmra.mrb[2].mxu1 %vm89_vm3, %v164_v19 }
 0x28b   :  { %v240_v21 = vpop.f32.mrb[2].mxu1 }
 0x28c   :  { %v241_v22 = vadd.f32 %v240_v21, %v169_v20  ;;  %v272_v23 = vpop.f32.mrb[3].mxu1 }
 0x28e   :  { %244 = vst [vmem:[%s357_s7] sm:$0x7] %v241_v22 }

</bundles_post_ra>
